<compile_context>
chip_gen: v6e
topology: v6e:2x2x1
jax: 0.10.0
libtpu: 0.0.40
codegen_flags: <defaults>
</compile_context>

<pallas_src>
import functools

import jax
import jax.numpy as jnp
from jax.experimental import pallas as pl
from jax.experimental.pallas import tpu as pltpu

_D_IN, _D_H0, _D_H1, _D_OUT = 256, 256, 128, 64
_D_OUT_PAD = 128  # lane-dense padded width of the final layer


def _round_up(n, m):
    return -(-n // m) * m


def _elu(v):
    # ELU, alpha=1.0 (matches F.elu default). f32 math; clamp keeps the
    # untaken exp branch finite for large positive v.
    return jnp.where(v > 0, v, jnp.exp(jnp.minimum(v, 0.0)) - 1.0)


def mlp_kernel(x_ref, w0_ref, b0_ref, w1_ref, b1_ref, w2_ref, b2_ref, o_ref):
    cdt = w0_ref.dtype  # MXU input dtype (float32 or bfloat16)
    h = x_ref[...].astype(cdt)  # cast in-kernel: no extra HBM pass in the wrapper
    h = _elu(jnp.dot(h, w0_ref[...], preferred_element_type=jnp.float32)
             + b0_ref[...])
    h = _elu(jnp.dot(h.astype(cdt), w1_ref[...], preferred_element_type=jnp.float32)
             + b1_ref[...])
    h = _elu(jnp.dot(h.astype(cdt), w2_ref[...], preferred_element_type=jnp.float32)
             + b2_ref[...])
    o_ref[...] = h.astype(o_ref.dtype)


def prepare_params(torch_params, *, use_bf16=True):
    """One-time conversion of PyTorch-shaped params (W: (out,in), b: (out,)) into
    kernel-ready arrays: W -> (in,out), b -> (1,out) f32, final layer zero-padded
    from 64 to 128 output columns. Do this OUTSIDE the per-call hot path.
    use_bf16=True (default, best on v6e/v7x) stores weights in bf16; the MXU
    accumulates in f32 and the ELU runs in f32 either way."""
    wdt = jnp.bfloat16 if use_bf16 else jnp.float32
    w0 = torch_params["w0"].T.astype(wdt)                                      # (256,256)
    w1 = torch_params["w1"].T.astype(wdt)                                      # (256,128)
    w2 = jnp.pad(torch_params["w2"].T,
                 ((0, 0), (0, _D_OUT_PAD - _D_OUT))).astype(wdt)               # (128,128)
    b0 = torch_params["b0"].reshape(1, -1).astype(jnp.float32)                 # (1,256)
    b1 = torch_params["b1"].reshape(1, -1).astype(jnp.float32)                 # (1,128)
    b2 = jnp.pad(torch_params["b2"],
                 (0, _D_OUT_PAD - _D_OUT)).reshape(1, -1).astype(jnp.float32)  # (1,128)
    return {"w0": w0, "b0": b0, "w1": w1, "b1": b1, "w2": w2, "b2": b2}


def _pick_tile_b(B):
    """HBM/overhead-bound kernel: pick the largest batch tile that still gives
    multiple grid steps (>=2 so v7x's two TensorCores both get work) for big B,
    and a single full-array block for small B (launch/DMA bound anyway)."""
    if B <= 512:
        return B          # single block == full array (grid=1, no masking needed)
    if B < 2048:
        return 256
    if B < 8192:
        return 1024
    return 2048


def disf_feat_3dmm_forward(x, prepared_params, *, tile_b=None, return_padded=False):
    """x: [B, 256]. prepared_params: output of prepare_params().
    Returns [B, 64] (or the lane-dense [B, 128] slab if return_padded=True; use
    that / call inside the consumer's jit so the final slice fuses)."""
    B, d_in = x.shape
    assert d_in == _D_IN, f"expected feature dim {_D_IN}, got {d_in}"
    out_dtype = x.dtype

    x_item = jnp.dtype(x.dtype).itemsize
    w_item = jnp.dtype(prepared_params["w0"].dtype).itemsize
    sublane = 16 if x_item == 2 else 8  # bf16 activations pack 2 rows / sublane

    if tile_b is None:
        tile_b = _pick_tile_b(B)
    elif tile_b != B:
        tile_b = _round_up(max(tile_b, sublane), sublane)

    grid = (pl.cdiv(B, tile_b),)  # last block may be partial; Pallas masks it

    # Explicit VMEM budget: double-buffered x/out tiles + weights + f32
    # intermediates (x, h0, h1, out + temps) + headroom; capped under v7x's 64 MiB.
    io_tile_bytes = tile_b * _D_IN * x_item + tile_b * _D_OUT_PAD * jnp.dtype(out_dtype).itemsize
    weight_bytes = (_D_IN * _D_H0 + _D_H0 * _D_H1 + _D_H1 * _D_OUT_PAD) * w_item \
        + (_D_H0 + _D_H1 + _D_OUT_PAD) * 4
    compute_bytes = 2 * tile_b * (_D_IN + _D_H0 + _D_H1 + _D_OUT_PAD) * 4
    vmem_limit = int(min(max(2 * io_tile_bytes + 2 * weight_bytes + compute_bytes
                             + (8 << 20), 16 << 20), 48 << 20))

    out_padded = pl.pallas_call(
        mlp_kernel,
        out_shape=jax.ShapeDtypeStruct((B, _D_OUT_PAD), out_dtype),
        grid_spec=pltpu.PrefetchScalarGridSpec(
            num_scalar_prefetch=0,
            grid=grid,
            in_specs=[
                pl.BlockSpec((tile_b, _D_IN), lambda i: (i, 0)),        # x tile
                pl.BlockSpec((_D_IN, _D_H0), lambda i: (0, 0)),         # W0
                pl.BlockSpec((1, _D_H0), lambda i: (0, 0)),             # b0
                pl.BlockSpec((_D_H0, _D_H1), lambda i: (0, 0)),         # W1
                pl.BlockSpec((1, _D_H1), lambda i: (0, 0)),             # b1
                pl.BlockSpec((_D_H1, _D_OUT_PAD), lambda i: (0, 0)),    # W2 (padded)
                pl.BlockSpec((1, _D_OUT_PAD), lambda i: (0, 0)),        # b2 (padded)
            ],
            out_specs=pl.BlockSpec((tile_b, _D_OUT_PAD), lambda i: (i, 0)),
        ),
        compiler_params=pltpu.CompilerParams(
            dimension_semantics=("parallel",),   # shards batch steps across v7x TCs
            vmem_limit_bytes=vmem_limit,
        ),
    )(x, prepared_params["w0"], prepared_params["b0"],
      prepared_params["w1"], prepared_params["b1"],
      prepared_params["w2"], prepared_params["b2"])

    if return_padded:
        return out_padded
    return out_padded[:, :_D_OUT]


def init_params(key):
    """Deterministic PyTorch-shaped params: W_l is (out_features, in_features)."""
    dims = [(_D_H0, _D_IN), (_D_H1, _D_H0), (_D_OUT, _D_H1)]
    params = {}
    for idx, (out_f, in_f) in enumerate(dims):
        key, kw, kb = jax.random.split(key, 3)
        bound = 1.0 / jnp.sqrt(in_f)
        params[f"w{idx}"] = jax.random.uniform(kw, (out_f, in_f), jnp.float32, -bound, bound)
        params[f"b{idx}"] = jax.random.uniform(kb, (out_f,), jnp.float32, -bound, bound)
    return params


def reference_forward(x, torch_params):
    def elu(v):
        return jnp.where(v > 0, v, jnp.exp(jnp.minimum(v, 0.0)) - 1.0)
    h = elu(x @ torch_params["w0"].T + torch_params["b0"])
    h = elu(h @ torch_params["w1"].T + torch_params["b1"])
    h = elu(h @ torch_params["w2"].T + torch_params["b2"])
    return h


if __name__ == "__main__":
    key = jax.random.PRNGKey(0)
    key, kx = jax.random.split(key)
    torch_params = init_params(key)

    # Prepare (transpose / pad / reshape) once, outside the per-call path.
    prepared_f32 = prepare_params(torch_params, use_bf16=False)
    prepared_bf16 = prepare_params(torch_params, use_bf16=True)  # v6e/v7x default

    # jit the wrapper so the final [:, :64] slice stays fused with the kernel call.
    fwd_f32 = jax.jit(functools.partial(disf_feat_3dmm_forward, prepared_params=prepared_f32))
    fwd_bf16 = jax.jit(functools.partial(disf_feat_3dmm_forward, prepared_params=prepared_bf16))

    # f32 path, tight tolerance: small exact-fit batch and a multi-step grid with
    # a masked partial last block (600 = 2*256 + 88).
    for B in (8, 600):
        x = jax.random.normal(jax.random.fold_in(kx, B), (B, _D_IN), jnp.float32)
        out = jax.block_until_ready(fwd_f32(x))
        ref = reference_forward(x, torch_params)
        assert out.shape == (B, _D_OUT), out.shape
        assert jnp.allclose(out, ref, atol=1e-5, rtol=1e-5), \
            (B, float(jnp.max(jnp.abs(out - ref))))

    # bf16 weight/MXU path (f32 accumulation + f32 ELU), relaxed tolerance.
    B = 600
    x = jax.random.normal(jax.random.fold_in(kx, 1000 + B), (B, _D_IN), jnp.float32)
    out_bf = jax.block_until_ready(fwd_bf16(x))
    ref = reference_forward(x, torch_params)
    assert out_bf.shape == (B, _D_OUT), out_bf.shape
    assert jnp.allclose(out_bf, ref, atol=5e-2, rtol=5e-2), \
        float(jnp.max(jnp.abs(out_bf - ref)))

    print("KERNEL_OK")
</pallas_src>

<mosaic_0001>
module attributes {stable_mosaic.version = 11 : i64} {
  func.func @mlp_kernel(%arg0: i32, %arg1: memref<8x256xf32, #tpu.memory_space<vmem>>, %arg2: memref<256x256xf32, #tpu.memory_space<vmem>>, %arg3: memref<1x256xf32, #tpu.memory_space<vmem>>, %arg4: memref<256x128xf32, #tpu.memory_space<vmem>>, %arg5: memref<1x128xf32, #tpu.memory_space<vmem>>, %arg6: memref<128x128xf32, #tpu.memory_space<vmem>>, %arg7: memref<1x128xf32, #tpu.memory_space<vmem>>, %arg8: memref<8x128xf32, #tpu.memory_space<vmem>>) attributes {dimension_semantics = [#tpu.dimension_semantics<parallel>], iteration_bounds = array<i64: 1>, scalar_prefetch = 0 : i64, scratch_operands = 0 : i64, tpu.core_type = #tpu.core_type<tc>, window_params = [{transform_indices = @transform_0, window_bounds = array<i64: 8, 256>}, {pipeline_mode = #tpu.pipeline_mode<synchronous>, transform_indices = @transform_1, window_bounds = array<i64: 256, 256>}, {pipeline_mode = #tpu.pipeline_mode<synchronous>, transform_indices = @transform_2, window_bounds = array<i64: 1, 256>}, {pipeline_mode = #tpu.pipeline_mode<synchronous>, transform_indices = @transform_3, window_bounds = array<i64: 256, 128>}, {pipeline_mode = #tpu.pipeline_mode<synchronous>, transform_indices = @transform_4, window_bounds = array<i64: 1, 128>}, {pipeline_mode = #tpu.pipeline_mode<synchronous>, transform_indices = @transform_5, window_bounds = array<i64: 128, 128>}, {pipeline_mode = #tpu.pipeline_mode<synchronous>, transform_indices = @transform_6, window_bounds = array<i64: 1, 128>}, {transform_indices = @transform_7, window_bounds = array<i64: 8, 128>}]} {
    %c0 = arith.constant 0 : index
    %c0_0 = arith.constant 0 : index
    %0 = vector.load %arg1[%c0, %c0_0] : memref<8x256xf32, #tpu.memory_space<vmem>>, vector<8x256xf32>
    %c0_1 = arith.constant 0 : index
    %c0_2 = arith.constant 0 : index
    %1 = vector.load %arg2[%c0_1, %c0_2] : memref<256x256xf32, #tpu.memory_space<vmem>>, vector<256x256xf32>
    %cst = arith.constant dense<0.000000e+00> : vector<8x256xf32>
    %2 = tpu.matmul %0, %1, %cst {dimension_numbers = #tpu.dot_dimension_numbers<[1], [0], [0], [1], [0, 0, 1, 1], [], []>} : vector<8x256xf32>, vector<256x256xf32>, vector<8x256xf32> -> vector<8x256xf32>
    %c0_3 = arith.constant 0 : index
    %c0_4 = arith.constant 0 : index
    %3 = vector.load %arg3[%c0_3, %c0_4] : memref<1x256xf32, #tpu.memory_space<vmem>>, vector<1x256xf32>
    %4 = vector.broadcast %3 : vector<1x256xf32> to vector<8x256xf32>
    %5 = arith.addf %2, %4 : vector<8x256xf32>
    %cst_5 = arith.constant 0.000000e+00 : f32
    %6 = vector.broadcast %cst_5 : f32 to vector<8x256xf32>
    %7 = arith.cmpf ogt, %5, %6 : vector<8x256xf32>
    %cst_6 = arith.constant 0.000000e+00 : f32
    %8 = vector.broadcast %cst_6 : f32 to vector<8x256xf32>
    %9 = arith.minimumf %5, %8 : vector<8x256xf32>
    %10 = math.exp %9 : vector<8x256xf32>
    %cst_7 = arith.constant 1.000000e+00 : f32
    %11 = vector.broadcast %cst_7 : f32 to vector<8x256xf32>
    %12 = arith.subf %10, %11 : vector<8x256xf32>
    %13 = arith.select %7, %5, %12 : vector<8x256xi1>, vector<8x256xf32>
    %c0_8 = arith.constant 0 : index
    %c0_9 = arith.constant 0 : index
    %14 = vector.load %arg4[%c0_8, %c0_9] : memref<256x128xf32, #tpu.memory_space<vmem>>, vector<256x128xf32>
    %cst_10 = arith.constant dense<0.000000e+00> : vector<8x128xf32>
    %15 = tpu.matmul %13, %14, %cst_10 {dimension_numbers = #tpu.dot_dimension_numbers<[1], [0], [0], [1], [0, 0, 1, 1], [], []>} : vector<8x256xf32>, vector<256x128xf32>, vector<8x128xf32> -> vector<8x128xf32>
    %c0_11 = arith.constant 0 : index
    %c0_12 = arith.constant 0 : index
    %16 = vector.load %arg5[%c0_11, %c0_12] : memref<1x128xf32, #tpu.memory_space<vmem>>, vector<1x128xf32>
    %17 = vector.broadcast %16 : vector<1x128xf32> to vector<8x128xf32>
    %18 = arith.addf %15, %17 : vector<8x128xf32>
    %cst_13 = arith.constant 0.000000e+00 : f32
    %19 = vector.broadcast %cst_13 : f32 to vector<8x128xf32>
    %20 = arith.cmpf ogt, %18, %19 : vector<8x128xf32>
    %cst_14 = arith.constant 0.000000e+00 : f32
    %21 = vector.broadcast %cst_14 : f32 to vector<8x128xf32>
    %22 = arith.minimumf %18, %21 : vector<8x128xf32>
    %23 = math.exp %22 : vector<8x128xf32>
    %cst_15 = arith.constant 1.000000e+00 : f32
    %24 = vector.broadcast %cst_15 : f32 to vector<8x128xf32>
    %25 = arith.subf %23, %24 : vector<8x128xf32>
    %26 = arith.select %20, %18, %25 : vector<8x128xi1>, vector<8x128xf32>
    %c0_16 = arith.constant 0 : index
    %c0_17 = arith.constant 0 : index
    %27 = vector.load %arg6[%c0_16, %c0_17] : memref<128x128xf32, #tpu.memory_space<vmem>>, vector<128x128xf32>
    %cst_18 = arith.constant dense<0.000000e+00> : vector<8x128xf32>
    %28 = tpu.matmul %26, %27, %cst_18 {dimension_numbers = #tpu.dot_dimension_numbers<[1], [0], [0], [1], [0, 0, 1, 1], [], []>} : vector<8x128xf32>, vector<128x128xf32>, vector<8x128xf32> -> vector<8x128xf32>
    %c0_19 = arith.constant 0 : index
    %c0_20 = arith.constant 0 : index
    %29 = vector.load %arg7[%c0_19, %c0_20] : memref<1x128xf32, #tpu.memory_space<vmem>>, vector<1x128xf32>
    %30 = vector.broadcast %29 : vector<1x128xf32> to vector<8x128xf32>
    %31 = arith.addf %28, %30 : vector<8x128xf32>
    %cst_21 = arith.constant 0.000000e+00 : f32
    %32 = vector.broadcast %cst_21 : f32 to vector<8x128xf32>
    %33 = arith.cmpf ogt, %31, %32 : vector<8x128xf32>
    %cst_22 = arith.constant 0.000000e+00 : f32
    %34 = vector.broadcast %cst_22 : f32 to vector<8x128xf32>
    %35 = arith.minimumf %31, %34 : vector<8x128xf32>
    %36 = math.exp %35 : vector<8x128xf32>
    %cst_23 = arith.constant 1.000000e+00 : f32
    %37 = vector.broadcast %cst_23 : f32 to vector<8x128xf32>
    %38 = arith.subf %36, %37 : vector<8x128xf32>
    %39 = arith.select %33, %31, %38 : vector<8x128xi1>, vector<8x128xf32>
    %c0_24 = arith.constant 0 : index
    %c0_25 = arith.constant 0 : index
    %40 = vector.load %arg8[%c0_24, %c0_25] : memref<8x128xf32, #tpu.memory_space<vmem>>, vector<8x128xf32>
    tpu.vector_store %arg8[%c0_24, %c0_25], %39 {strides = array<i32>} : memref<8x128xf32, #tpu.memory_space<vmem>>, vector<8x128xf32>,
    return
  }
  func.func @transform_0(%arg0: i32) -> (i32, i32) {
    %c0_i32 = arith.constant 0 : i32
    %c0_i32_0 = arith.constant 0 : i32
    return %arg0, %c0_i32 : i32, i32
  }
  func.func @transform_1(%arg0: i32) -> (i32, i32) {
    %c0_i32 = arith.constant 0 : i32
    %c0_i32_0 = arith.constant 0 : i32
    %c0_i32_1 = arith.constant 0 : i32
    return %c0_i32, %c0_i32_0 : i32, i32
  }
  func.func @transform_2(%arg0: i32) -> (i32, i32) {
    %c0_i32 = arith.constant 0 : i32
    %c0_i32_0 = arith.constant 0 : i32
    %c0_i32_1 = arith.constant 0 : i32
    return %c0_i32, %c0_i32_0 : i32, i32
  }
  func.func @transform_3(%arg0: i32) -> (i32, i32) {
    %c0_i32 = arith.constant 0 : i32
    %c0_i32_0 = arith.constant 0 : i32
    %c0_i32_1 = arith.constant 0 : i32
    return %c0_i32, %c0_i32_0 : i32, i32
  }
  func.func @transform_4(%arg0: i32) -> (i32, i32) {
    %c0_i32 = arith.constant 0 : i32
    %c0_i32_0 = arith.constant 0 : i32
    %c0_i32_1 = arith.constant 0 : i32
    return %c0_i32, %c0_i32_0 : i32, i32
  }
  func.func @transform_5(%arg0: i32) -> (i32, i32) {
    %c0_i32 = arith.constant 0 : i32
    %c0_i32_0 = arith.constant 0 : i32
    %c0_i32_1 = arith.constant 0 : i32
    return %c0_i32, %c0_i32_0 : i32, i32
  }
  func.func @transform_6(%arg0: i32) -> (i32, i32) {
    %c0_i32 = arith.constant 0 : i32
    %c0_i32_0 = arith.constant 0 : i32
    %c0_i32_1 = arith.constant 0 : i32
    return %c0_i32, %c0_i32_0 : i32, i32
  }
  func.func @transform_7(%arg0: i32) -> (i32, i32) {
    %c0_i32 = arith.constant 0 : i32
    %c0_i32_0 = arith.constant 0 : i32
    return %arg0, %c0_i32 : i32, i32
  }
}

</mosaic_0001>

<bundles_post_ra>
// kernel: disf_feat_3dmm_forward.1
= control target key start
LH: loop header
LB: loop body
LE: loop exit
PB: predicated region body
PF: predicated region fallthrough
CT: control target
= control target key end

     0   :  { %12 = vsyncpa [#allocation3], 0  ;;  %s785_s0 = inlined_call_operand.hbm [shape: f32[8,256], index: 0, kind: input, shape index: {}]   ;;  %s786_s1 = inlined_call_operand.hbm [shape: f32[256,256], index: 1, kind: input, shape index: {}]   ;;  %s787_s2 = inlined_call_operand.vmem [shape: f32[1,256], index: 2, kind: input, shape index: {}]   ;;  %s788_s3 = inlined_call_operand.hbm [shape: f32[256,128], index: 3, kind: input, shape index: {}]   ;;  %s789_s4 = inlined_call_operand.vmem [shape: f32[1,128], index: 4, kind: input, shape index: {}]   ;;  %s790_s5 = inlined_call_operand.hbm [shape: f32[128,128], index: 5, kind: input, shape index: {}]   ;;  %s791_s6 = inlined_call_operand.vmem [shape: f32[1,128], index: 6, kind: input, shape index: {}]   ;;  %s792_s7 = inlined_call_operand.hbm [shape: f32[8,128], index: 7, kind: output, shape index: {}]  }
   0x1   :  { %13 = vsyncpa [#allocation6], 0 }
   0x2   :  { %14 = vsyncpa [#allocation9], 0 }
   0x3   :  { %15 = vsyncpa [#allocation4], 0  ;;  %s693_s24 = smov [#allocation5]  }
   0x4   :  { %s31_s25 = sshll.u32 %s693_s24, 4  ;;  %s32_s25 = int_to_ptr.vmem [resolvable:$true] %s31_s25 }
   0x5   :  { %s593_s26 = scalar_lea.vmem %s32_s25, 8192  ;;  %p598_p1 = scmp.lt.s32.totalorder %s32_s25, %s32_s25 }
   0x6   :  { %p594_p0 = scmp.ne.s32.totalorder %s32_s25, %s593_s26  ;;  %p599_p2 = scmp.lt.s32.totalorder %s593_s26, %s593_s26 }
   0x8   :  { %p600_p3 = por %p599_p2, %p598_p1 }
   0xa   :  { %p601_p4 = pnand %p600_p3, %p594_p0 }
   0xc   :  { %604 = shalt.err (!%p601_p4)
}
   0xd   :  { %s694_s27 = smov 256   ;;  %s695_s28 = smov 16  }
   0xe   :  { %37 = dma.hbm_to_vmem [thread:$0]  %s786_s1, 8192, %s32_s25, [#allocation6], %s694_s27, %s694_s27, %s695_s28  }
   0xf   :  { %s696_s8 = smov [#allocation2]   ;;  %s697_s10 = smov [#allocation7]  }
  0x10   :  { %s22_s9 = sshll.u32 %s696_s8, 4  ;;  %s45_s11 = sshll.u32 %s697_s10, 4  ;;  %s23_s9 = int_to_ptr.vmem [resolvable:$true] %s22_s9  ;;  %s46_s11 = int_to_ptr.vmem [resolvable:$true] %s45_s11 }
  0x11   :  { %s613_s12 = scalar_lea.vmem %s23_s9, 256  ;;  %p618_p6 = scmp.lt.s32.totalorder %s23_s9, %s23_s9 }
  0x12   :  { %p614_p5 = scmp.ne.s32.totalorder %s23_s9, %s613_s12  ;;  %p619_p7 = scmp.lt.s32.totalorder %s613_s12, %s613_s12 }
  0x14   :  { %p620_p8 = por %p619_p7, %p618_p6 }
  0x16   :  { %p621_p9 = pnand %p620_p8, %p614_p5 }
  0x18   :  { %624 = shalt.err (!%p621_p9)
}
  0x19   :  { %25 = dma.hbm_to_vmem [thread:$0]  %s785_s0, 256, %s23_s9, [#allocation3]  }
  0x1a   :  { %s633_s15 = scalar_lea.vmem %s46_s11, 4096  ;;  %p638_p11 = scmp.lt.s32.totalorder %s46_s11, %s46_s11 }
  0x1b   :  { %p634_p10 = scmp.ne.s32.totalorder %s46_s11, %s633_s15  ;;  %p639_p12 = scmp.lt.s32.totalorder %s633_s15, %s633_s15 }
  0x1d   :  { %p640_p13 = por %p639_p12, %p638_p11 }
  0x1f   :  { %p641_p0 = pnand %p640_p13, %p634_p10 }
  0x21   :  { %644 = shalt.err (!%p641_p0)
}
  0x22   :  { %s698_s1 = smov 128   ;;  %s699_s16 = smov 8  }
  0x23   :  { %51 = dma.hbm_to_vmem [thread:$0]  %s788_s3, 4096, %s46_s11, [#allocation6], %s698_s1, %s698_s1, %s699_s16  }
  0x24   :  { %s700_s19 = smov [#allocation8]  }
  0x25   :  { %s59_s20 = sshll.u32 %s700_s19, 4  ;;  %s60_s20 = int_to_ptr.vmem [resolvable:$true] %s59_s20 }
  0x26   :  { %s653_s21 = scalar_lea.vmem %s60_s20, 2048  ;;  %p658_p2 = scmp.lt.s32.totalorder %s60_s20, %s60_s20 }
  0x27   :  { %p654_p1 = scmp.ne.s32.totalorder %s60_s20, %s653_s21  ;;  %p659_p3 = scmp.lt.s32.totalorder %s653_s21, %s653_s21 }
  0x29   :  { %p660_p4 = por %p659_p3, %p658_p2 }
  0x2b   :  { %p661_p5 = pnand %p660_p4, %p654_p1 }
  0x2d   :  { %664 = shalt.err (!%p661_p5)
}
  0x2e   :  { %65 = dma.hbm_to_vmem [thread:$0]  %s790_s5, 2048, %s60_s20, [#allocation9], %s698_s1, %s698_s1, %s699_s16  }
  0x2f   :  { %685 = dma.done.wait [#allocation3], 256  }
  0x30   :  { %686 = vsyncadd [#allocation3], 4294967040 }
  0x31   :  { %687 = dma.done.wait [#allocation6], 12288  }
  0x32   :  { %688 = vsyncadd [#allocation6], 4294955008 }
  0x33   :  { %689 = dma.done.wait [#allocation9], 2048  }
  0x34   :  { %690 = vsyncadd [#allocation9], 4294965248  ;;  %v113_v0 = vld [vmem:[#allocation5 + $0xf8] sm:$0xff]  ;;  %v112_v1 = vld [vmem:[#allocation5 + $0xf0] sm:$0xff]  ;;  %vm702_vm2 = vmmov 0  }
  0x35   :  { %v111_v2 = vld [vmem:[#allocation5 + $0xe8] sm:$0xff]  ;;  %158 = vmatprep.subr.mxu0 %v113_v0  ;;  %v110_v3 = vld [vmem:[#allocation5 + $0xe0] sm:$0xff]  ;;  %v109_v4 = vld [vmem:[#allocation5 + $0xd8] sm:$0xff] }
  0x36   :  { %159 = vmatpush1.msra.mxu0 %v112_v1  ;;  %v108_v5 = vld [vmem:[#allocation5 + $0xd0] sm:$0xff]  ;;  %v107_v6 = vld [vmem:[#allocation5 + $0xc8] sm:$0xff]  ;;  %v106_v7 = vld [vmem:[#allocation5 + $0xc0] sm:$0xff] }
  0x37   :  { %160 = vmatprep.subr.mxu0 %v111_v2  ;;  %v105_v8 = vld [vmem:[#allocation5 + $0xb8] sm:$0xff]  ;;  %v104_v9 = vld [vmem:[#allocation5 + $0xb0] sm:$0xff]  ;;  %v103_v10 = vld [vmem:[#allocation5 + $0xa8] sm:$0xff] }
  0x38   :  { %161 = vmatpush1.msra.mxu0 %v110_v3  ;;  %v102_v11 = vld [vmem:[#allocation5 + $0xa0] sm:$0xff]  ;;  %v101_v12 = vld [vmem:[#allocation5 + $0x98] sm:$0xff]  ;;  %v100_v13 = vld [vmem:[#allocation5 + $0x90] sm:$0xff] }
  0x39   :  { %162 = vmatprep.subr.mxu0 %v109_v4  ;;  %v99_v14 = vld [vmem:[#allocation5 + $0x88] sm:$0xff]  ;;  %v98_v15 = vld [vmem:[#allocation5 + $0x80] sm:$0xff]  ;;  %v97_v16 = vld [vmem:[#allocation5 + $0x78] sm:$0xff] }
  0x3a   :  { %163 = vmatpush1.msra.mxu0 %v108_v5  ;;  %v96_v17 = vld [vmem:[#allocation5 + $0x70] sm:$0xff]  ;;  %v95_v18 = vld [vmem:[#allocation5 + $0x68] sm:$0xff]  ;;  %v94_v19 = vld [vmem:[#allocation5 + $0x60] sm:$0xff] }
  0x3b   :  { %164 = vmatprep.subr.mxu0 %v107_v6  ;;  %v93_v20 = vld [vmem:[#allocation5 + $0x58] sm:$0xff]  ;;  %v92_v21 = vld [vmem:[#allocation5 + $0x50] sm:$0xff]  ;;  %v91_v22 = vld [vmem:[#allocation5 + $0x48] sm:$0xff] }
  0x3c   :  { %165 = vmatpush1.msra.mxu0 %v106_v7  ;;  %v90_v23 = vld [vmem:[#allocation5 + $0x40] sm:$0xff]  ;;  %v89_v24 = vld [vmem:[#allocation5 + $0x38] sm:$0xff]  ;;  %v271_v28 = vld [vmem:[#allocation7 + $0xf0] sm:$0xff] }
  0x3d   :  { %166 = vmatprep.subr.mxu0 %v105_v8  ;;  %v81_v25 = vld [vmem:[#allocation2 + $0x8] sm:$0xff]  ;;  %v88_v29 = vld [vmem:[#allocation5 + $0x30] sm:$0xff]  ;;  %v87_v31 = vld [vmem:[#allocation5 + $0x28] sm:$0xff] }
  0x3e   :  { %167 = vmatpush1.msra.mxu0 %v104_v9  ;;  %222 = vmatprep.mubr.f32.mxu0 %v81_v25  ;;  %v272_v26 = vld [vmem:[#allocation7 + $0xf8] sm:$0xff]  ;;  %v255_v30 = vld [vmem:[#allocation7 + $0x70] sm:$0xff]  ;;  %v270_v32 = vld [vmem:[#allocation7 + $0xe8] sm:$0xff] }
  0x3f   :  { %168 = vmatprep.subr.mxu0 %v103_v10  ;;  %v256_v27 = vld [vmem:[#allocation7 + $0x78] sm:$0xff]  ;;  %479 = vmatprep.subr.mxu1 %v272_v26  ;;  %v86_v33 = vld [vmem:[#allocation5 + $0x20] sm:$0xff]  ;;  %v84_v35 = vld [vmem:[#allocation5 + $0x10] sm:$0xff] }
  0x40   :  { %169 = vmatpush1.msra.mxu0 %v102_v11  ;;  %480 = vmatpush3.msra.mxu1 %v256_v27  ;;  %v85_v34 = vld [vmem:[#allocation5 + $0x18] sm:$0xff]  ;;  %v83_v36 = vld [vmem:[#allocation5 + $0x8] sm:$0xff]  ;;  %v82_v37 = vld [vmem:[#allocation5] sm:$0xff] }
  0x41   :  { %170 = vmatprep.subr.mxu0 %v101_v12  ;;  %481 = vmatprep.subr.mxu1 %v271_v28  ;;  %v145_v38 = vld [vmem:[#allocation5 + $0x1f8] sm:$0xff]  ;;  %v144_v39 = vld [vmem:[#allocation5 + $0x1f0] sm:$0xff]  ;;  %v143_v40 = vld [vmem:[#allocation5 + $0x1e8] sm:$0xff] }
  0x42   :  { %171 = vmatpush1.msra.mxu0 %v100_v13  ;;  %482 = vmatpush3.msra.mxu1 %v255_v30  ;;  %v142_v41 = vld [vmem:[#allocation5 + $0x1e0] sm:$0xff]  ;;  %v141_v42 = vld [vmem:[#allocation5 + $0x1d8] sm:$0xff]  ;;  %v140_v43 = vld [vmem:[#allocation5 + $0x1d0] sm:$0xff] }
  0x43   :  { %172 = vmatprep.subr.mxu0 %v99_v14  ;;  %483 = vmatprep.subr.mxu1 %v270_v32  ;;  %v139_v44 = vld [vmem:[#allocation5 + $0x1c8] sm:$0xff]  ;;  %v138_v45 = vld [vmem:[#allocation5 + $0x1c0] sm:$0xff]  ;;  %v137_v46 = vld [vmem:[#allocation5 + $0x1b8] sm:$0xff] }
  0x44   :  { %173 = vmatpush1.msra.mxu0 %v98_v15  ;;  %v136_v47 = vld [vmem:[#allocation5 + $0x1b0] sm:$0xff]  ;;  %v135_v48 = vld [vmem:[#allocation5 + $0x1a8] sm:$0xff]  ;;  %v134_v49 = vld [vmem:[#allocation5 + $0x1a0] sm:$0xff] }
  0x45   :  { %174 = vmatprep.subr.mxu0 %v97_v16  ;;  %v133_v50 = vld [vmem:[#allocation5 + $0x198] sm:$0xff]  ;;  %v132_v51 = vld [vmem:[#allocation5 + $0x190] sm:$0xff]  ;;  %v131_v52 = vld [vmem:[#allocation5 + $0x188] sm:$0xff] }
  0x46   :  { %175 = vmatpush1.msra.mxu0 %v96_v17  ;;  %v130_v53 = vld [vmem:[#allocation5 + $0x180] sm:$0xff]  ;;  %v129_v54 = vld [vmem:[#allocation5 + $0x178] sm:$0xff]  ;;  %v128_v55 = vld [vmem:[#allocation5 + $0x170] sm:$0xff] }
  0x47   :  { %176 = vmatprep.subr.mxu0 %v95_v18  ;;  %v127_v56 = vld [vmem:[#allocation5 + $0x168] sm:$0xff]  ;;  %v126_v57 = vld [vmem:[#allocation5 + $0x160] sm:$0xff]  ;;  %v125_v58 = vld [vmem:[#allocation5 + $0x158] sm:$0xff] }
  0x48   :  { %177 = vmatpush1.msra.mxu0 %v94_v19  ;;  %v124_v59 = vld [vmem:[#allocation5 + $0x150] sm:$0xff]  ;;  %v123_v60 = vld [vmem:[#allocation5 + $0x148] sm:$0xff]  ;;  %v122_v61 = vld [vmem:[#allocation5 + $0x140] sm:$0xff] }
  0x49   :  { %178 = vmatprep.subr.mxu0 %v93_v20  ;;  %v121_v62 = vld [vmem:[#allocation5 + $0x138] sm:$0xff]  ;;  %v120_v63 = vld [vmem:[#allocation5 + $0x130] sm:$0xff]  ;;  %v119_v0 = vld [vmem:[#allocation5 + $0x128] sm:$0xff] }
  0x4a   :  { %179 = vmatpush1.msra.mxu0 %v92_v21  ;;  %v118_v1 = vld [vmem:[#allocation5 + $0x120] sm:$0xff]  ;;  %v117_v2 = vld [vmem:[#allocation5 + $0x118] sm:$0xff]  ;;  %v116_v3 = vld [vmem:[#allocation5 + $0x110] sm:$0xff] }
  0x4b   :  { %180 = vmatprep.subr.mxu0 %v91_v22  ;;  %v115_v4 = vld [vmem:[#allocation5 + $0x108] sm:$0xff]  ;;  %v114_v5 = vld [vmem:[#allocation5 + $0x100] sm:$0xff]  ;;  %v80_v6 = vld [vmem:[#allocation2] sm:$0xff] }
  0x4c   :  { %181 = vmatpush1.msra.mxu0 %v90_v23  ;;  %v254_v7 = vld [vmem:[#allocation7 + $0x68] sm:$0xff]  ;;  %v269_v8 = vld [vmem:[#allocation7 + $0xe0] sm:$0xff]  ;;  %v268_v10 = vld [vmem:[#allocation7 + $0xd8] sm:$0xff] }
  0x4d   :  { %182 = vmatprep.subr.mxu0 %v89_v24  ;;  %484 = vmatpush3.msra.mxu1 %v254_v7  ;;  %v253_v9 = vld [vmem:[#allocation7 + $0x60] sm:$0xff]  ;;  %v252_v11 = vld [vmem:[#allocation7 + $0x58] sm:$0xff]  ;;  %v267_v12 = vld [vmem:[#allocation7 + $0xd0] sm:$0xff] }
  0x4e   :  { %183 = vmatpush1.msra.mxu0 %v88_v29  ;;  %485 = vmatprep.subr.mxu1 %v269_v8  ;;  %v251_v13 = vld [vmem:[#allocation7 + $0x50] sm:$0xff]  ;;  %v266_v14 = vld [vmem:[#allocation7 + $0xc8] sm:$0xff]  ;;  %v265_v16 = vld [vmem:[#allocation7 + $0xc0] sm:$0xff] }
  0x4f   :  { %184 = vmatprep.subr.mxu0 %v87_v31  ;;  %486 = vmatpush3.msra.mxu1 %v253_v9  ;;  %v250_v15 = vld [vmem:[#allocation7 + $0x48] sm:$0xff]  ;;  %v249_v17 = vld [vmem:[#allocation7 + $0x40] sm:$0xff]  ;;  %v264_v18 = vld [vmem:[#allocation7 + $0xb8] sm:$0xff] }
  0x50   :  { %185 = vmatpush1.msra.mxu0 %v86_v33  ;;  %487 = vmatprep.subr.mxu1 %v268_v10  ;;  %v248_v19 = vld [vmem:[#allocation7 + $0x38] sm:$0xff]  ;;  %v263_v20 = vld [vmem:[#allocation7 + $0xb0] sm:$0xff]  ;;  %v262_v22 = vld [vmem:[#allocation7 + $0xa8] sm:$0xff] }
  0x51   :  { %186 = vmatprep.subr.mxu0 %v85_v34  ;;  %488 = vmatpush3.msra.mxu1 %v252_v11  ;;  %v247_v21 = vld [vmem:[#allocation7 + $0x30] sm:$0xff]  ;;  %v246_v23 = vld [vmem:[#allocation7 + $0x28] sm:$0xff]  ;;  %v261_v24 = vld [vmem:[#allocation7 + $0xa0] sm:$0xff]  ;;  %v701_v34 = vmov 0.0  }
  0x52   :  { %187 = vmatpush1.msra.mxu0 %v84_v35  ;;  %489 = vmatprep.subr.mxu1 %v267_v12  ;;  %v245_v25 = vld [vmem:[#allocation7 + $0x20] sm:$0xff]  ;;  %v260_v26 = vld [vmem:[#allocation7 + $0x98] sm:$0xff]  ;;  %v259_v28 = vld [vmem:[#allocation7 + $0x90] sm:$0xff]  ;;  %v148_v35 = vlaneseq }
  0x53   :  { %188 = vmatprep.subr.mxu0 %v83_v36  ;;  %490 = vmatpush3.msra.mxu1 %v251_v13  ;;  %v244_v27 = vld [vmem:[#allocation7 + $0x18] sm:$0xff]  ;;  %v243_v29 = vld [vmem:[#allocation7 + $0x10] sm:$0xff]  ;;  %v258_v30 = vld [vmem:[#allocation7 + $0x88] sm:$0xff] }
  0x54   :  { %189 = vmatpush1.msra.mxu0 %v82_v37  ;;  %491 = vmatprep.subr.mxu1 %v266_v14  ;;  %v242_v31 = vld [vmem:[#allocation7 + $0x8] sm:$0xff]  ;;  %v257_v32 = vld [vmem:[#allocation7 + $0x80] sm:$0xff]  ;;  %v149_v36 = vshrl.u32 %v148_v35, 7  ;;  %v475_v9 = vld [vmem:[%s789_s4] ss:$0 sm:$0xff]  ;;  %s703_s4 = smov [#allocation10]  }
  0x55   :  { %190 = vmatprep.subr.mxu0 %v145_v38  ;;  %492 = vmatpush3.msra.mxu1 %v250_v15  ;;  %v241_v33 = vld [vmem:[#allocation7] sm:$0xff]  ;;  %v146_v38 = vld [vmem:[%s787_s2] sm:$0x3]  ;;  %s462_s26 = sshll.u32 %s703_s4, 4  ;;  %s463_s26 = int_to_ptr.vmem [resolvable:$true] %s462_s26 }
  0x56   :  { %191 = vmatpush2.msra.mxu0 %v144_v39  ;;  %493 = vmatprep.subr.mxu1 %v265_v16  ;;  %v150_v37 = vsub.s32 0, %v149_v36  ;;  %v154_v39 = vsub.s32 1, %v149_v36  ;;  %v356_v7 = vld [vmem:[#allocation8] sm:$0xff]  ;;  %s665_s27 = scalar_lea.vmem %s463_s26, 128  ;;  %p670_p7 = scmp.lt.s32.totalorder %s463_s26, %s463_s26 }
  0x57   :  { %192 = vmatprep.subr.mxu0 %v143_v40  ;;  %494 = vmatpush3.msra.mxu1 %v249_v17  ;;  %p666_p6 = scmp.ne.s32.totalorder %s463_s26, %s665_s27  ;;  %p671_p8 = scmp.lt.s32.totalorder %s665_s27, %s665_s27 }
  0x58   :  { %193 = vmatpush2.msra.mxu0 %v142_v41  ;;  %495 = vmatprep.subr.mxu1 %v264_v18  ;;  %v151_v40 = vrot.slane %v146_v38, %v150_v37  ;;  %v155_v41 = vrot.slane %v146_v38, %v154_v39  ;;  %v477_v18 = vld [vmem:[%s791_s6] ss:$0 sm:$0xff] }
  0x59   :  { %194 = vmatprep.subr.mxu0 %v141_v42  ;;  %496 = vmatpush3.msra.mxu1 %v248_v19  ;;  %p672_p9 = por %p671_p8, %p670_p7 }
  0x5a   :  { %195 = vmatpush2.msra.mxu0 %v140_v43  ;;  %497 = vmatprep.subr.mxu1 %v263_v20 }
  0x5b   :  { %196 = vmatprep.subr.mxu0 %v139_v44  ;;  %498 = vmatpush3.msra.mxu1 %v247_v21  ;;  %p673_p10 = pnand %p672_p9, %p666_p6 }
  0x5c   :  { %197 = vmatpush2.msra.mxu0 %v138_v45  ;;  %499 = vmatprep.subr.mxu1 %v262_v22 }
  0x5d   :  { %198 = vmatprep.subr.mxu0 %v137_v46  ;;  %500 = vmatpush3.msra.mxu1 %v246_v23 }
  0x5e   :  { %199 = vmatpush2.msra.mxu0 %v136_v47  ;;  %501 = vmatprep.subr.mxu1 %v261_v24 }
  0x5f   :  { %200 = vmatprep.subr.mxu0 %v135_v48  ;;  %502 = vmatpush3.msra.mxu1 %v245_v25 }
  0x60   :  { %201 = vmatpush2.msra.mxu0 %v134_v49  ;;  %503 = vmatprep.subr.mxu1 %v260_v26 }
  0x61   :  { %202 = vmatprep.subr.mxu0 %v133_v50  ;;  %504 = vmatpush3.msra.mxu1 %v244_v27 }
  0x62   :  { %203 = vmatpush2.msra.mxu0 %v132_v51  ;;  %505 = vmatprep.subr.mxu1 %v259_v28 }
  0x63   :  { %204 = vmatprep.subr.mxu0 %v131_v52  ;;  %506 = vmatpush3.msra.mxu1 %v243_v29 }
  0x64   :  { %205 = vmatpush2.msra.mxu0 %v130_v53  ;;  %507 = vmatprep.subr.mxu1 %v258_v30 }
  0x65   :  { %206 = vmatprep.subr.mxu0 %v129_v54  ;;  %508 = vmatpush3.msra.mxu1 %v242_v31 }
  0x66   :  { %207 = vmatpush2.msra.mxu0 %v128_v55  ;;  %509 = vmatprep.subr.mxu1 %v257_v32  ;;  %v371_v55 = vld [vmem:[#allocation8 + $0x78] sm:$0xff] }
  0x67   :  { %208 = vmatprep.subr.mxu0 %v127_v56  ;;  %510 = vmatpush3.msra.mxu1 %v241_v33 }
  0x68   :  { %209 = vmatpush2.msra.mxu0 %v126_v57  ;;  %531 = vmatprep.subr.mxu1 %v701_v34  ;;  %v370_v57 = vld [vmem:[#allocation8 + $0x70] sm:$0xff] }
  0x69   :  { %210 = vmatprep.subr.mxu0 %v125_v58  ;;  %v369_v58 = vld [vmem:[#allocation8 + $0x68] sm:$0xff] }
  0x6a   :  { %211 = vmatpush2.msra.mxu0 %v124_v59  ;;  %v368_v59 = vld [vmem:[#allocation8 + $0x60] sm:$0xff] }
  0x6b   :  { %212 = vmatprep.subr.mxu0 %v123_v60  ;;  %v367_v60 = vld [vmem:[#allocation8 + $0x58] sm:$0xff] }
  0x6c   :  { %213 = vmatpush2.msra.mxu0 %v122_v61  ;;  %v366_v61 = vld [vmem:[#allocation8 + $0x50] sm:$0xff] }
  0x6d   :  { %214 = vmatprep.subr.mxu0 %v121_v62  ;;  %v365_v62 = vld [vmem:[#allocation8 + $0x48] sm:$0xff] }
  0x6e   :  { %215 = vmatpush2.msra.mxu0 %v120_v63  ;;  %v364_v63 = vld [vmem:[#allocation8 + $0x40] sm:$0xff] }
  0x6f   :  { %216 = vmatprep.subr.mxu0 %v119_v0  ;;  %v363_v0 = vld [vmem:[#allocation8 + $0x38] sm:$0xff] }
  0x70   :  { %217 = vmatpush2.msra.mxu0 %v118_v1  ;;  %v362_v1 = vld [vmem:[#allocation8 + $0x30] sm:$0xff] }
  0x71   :  { %218 = vmatprep.subr.mxu0 %v117_v2  ;;  %v361_v2 = vld [vmem:[#allocation8 + $0x28] sm:$0xff] }
  0x72   :  { %219 = vmatpush2.msra.mxu0 %v116_v3  ;;  %v360_v3 = vld [vmem:[#allocation8 + $0x20] sm:$0xff] }
  0x73   :  { %220 = vmatprep.subr.mxu0 %v115_v4  ;;  %v359_v4 = vld [vmem:[#allocation8 + $0x18] sm:$0xff] }
  0x74   :  { %221 = vmatpush2.msra.mxu0 %v114_v5  ;;  %v358_v5 = vld [vmem:[#allocation8 + $0x10] sm:$0xff] }
  0x75   :  { %223 = vmatmul.mubr.f32.vlgmr.msra.gmra.mxu0 %v80_v6  ;;  %v357_v6 = vld [vmem:[#allocation8 + $0x8] sm:$0xff] }
 0x135   :  { %v224_v42 = vpop.f32.mrf.mxu0 }
 0x136   :  { %v225_v43 = vadd.f32 %v224_v42, %v151_v40 }
 0x137   :  { %v226_v44 = vpop.f32.mrf.mxu0 }
 0x138   :  { %v231_v45 = vmin.f32 %v225_v43, 0.0  ;;  %v227_v46 = vadd.f32 %v226_v44, %v155_v41  ;;  %vm229_vm1 = vcmp.gt.f32.partialorder %v225_v43, 0.0 }
 0x13a   :  { %v233_v47 = vmul.f32 1.442695, %v231_v45  ;;  %v232_v48 = vmin.f32 %v227_v46, 0.0  ;;  %vm230_vm0 = vcmp.gt.f32.partialorder %v227_v46, 0.0 }
 0x13c   :  { %577 = vpow2.f32 %v233_v47  ;;  %v235_v49 = vmul.f32 1.442695, %v232_v48 }
 0x13e   :  { %579 = vpow2.f32 %v235_v49 }
 0x149   :  { %v578_v50 = vpop.eup %577 }
 0x14a   :  { %v473_v52 = vadd.f32 -1.0, %v578_v50 }
 0x14b   :  { %v580_v51 = vpop.eup %579 }
 0x14c   :  { %v474_v53 = vadd.f32 -1.0, %v580_v51  ;;  %v239_v56 = vsel %vm229_vm1, %v225_v43, %v473_v52 }
 0x14e   :  { %v240_v54 = vsel %vm230_vm0, %v227_v46, %v474_v53 }
 0x14f   :  { %344 = vmatprep.mubr.f32.mxu1 %v240_v54 }
 0x150   :  { %345 = vmatmul.mubr.f32.vlgmr.msra.gmra.mxu1 %v239_v56 }
 0x151   :  { %532 = vmatpush3.msra.mxu1 %v371_v55  ;;  %563 = vmatprep.mubr.msk.f32.mxu1 %vm702_vm2, %v701_v34 }
 0x152   :  { %533 = vmatprep.subr.mxu1 %v701_v34 }
 0x153   :  { %534 = vmatpush3.msra.mxu1 %v370_v57 }
 0x154   :  { %535 = vmatprep.subr.mxu1 %v701_v34 }
 0x155   :  { %536 = vmatpush3.msra.mxu1 %v369_v58 }
 0x156   :  { %537 = vmatprep.subr.mxu1 %v701_v34 }
 0x157   :  { %538 = vmatpush3.msra.mxu1 %v368_v59 }
 0x158   :  { %539 = vmatprep.subr.mxu1 %v701_v34 }
 0x159   :  { %540 = vmatpush3.msra.mxu1 %v367_v60 }
 0x15a   :  { %541 = vmatprep.subr.mxu1 %v701_v34 }
 0x15b   :  { %542 = vmatpush3.msra.mxu1 %v366_v61 }
 0x15c   :  { %543 = vmatprep.subr.mxu1 %v701_v34 }
 0x15d   :  { %544 = vmatpush3.msra.mxu1 %v365_v62 }
 0x15e   :  { %545 = vmatprep.subr.mxu1 %v701_v34 }
 0x15f   :  { %546 = vmatpush3.msra.mxu1 %v364_v63 }
 0x160   :  { %547 = vmatprep.subr.mxu1 %v701_v34 }
 0x161   :  { %548 = vmatpush3.msra.mxu1 %v363_v0 }
 0x162   :  { %549 = vmatprep.subr.mxu1 %v701_v34 }
 0x163   :  { %550 = vmatpush3.msra.mxu1 %v362_v1 }
 0x164   :  { %551 = vmatprep.subr.mxu1 %v701_v34 }
 0x165   :  { %552 = vmatpush3.msra.mxu1 %v361_v2 }
 0x166   :  { %553 = vmatprep.subr.mxu1 %v701_v34 }
 0x167   :  { %554 = vmatpush3.msra.mxu1 %v360_v3 }
 0x168   :  { %555 = vmatprep.subr.mxu1 %v701_v34 }
 0x169   :  { %556 = vmatpush3.msra.mxu1 %v359_v4 }
 0x16a   :  { %557 = vmatprep.subr.mxu1 %v701_v34 }
 0x16b   :  { %558 = vmatpush3.msra.mxu1 %v358_v5 }
 0x16c   :  { %559 = vmatprep.subr.mxu1 %v701_v34 }
 0x16d   :  { %560 = vmatpush3.msra.mxu1 %v357_v6 }
 0x16e   :  { %561 = vmatprep.subr.mxu1 %v701_v34 }
 0x16f   :  { %562 = vmatpush3.msra.mxu1 %v356_v7 }
 0x210   :  { %v511_v8 = vpop.f32.mrf.mxu1 }
 0x212   :  { %v512_v10 = vpop.f32.mrf.mxu1 }
 0x213   :  { %v513_v11 = vadd.f32 %v512_v10, %v511_v8 }
 0x215   :  { %v347_v12 = vadd.f32 %v513_v11, %v475_v9 }
 0x217   :  { %v351_v13 = vmin.f32 %v347_v12, 0.0  ;;  %vm350_vm3 = vcmp.gt.f32.partialorder %v347_v12, 0.0 }
 0x219   :  { %v352_v14 = vmul.f32 1.442695, %v351_v13 }
 0x21b   :  { %581 = vpow2.f32 %v352_v14 }
 0x228   :  { %v582_v15 = vpop.eup %581 }
 0x229   :  { %v476_v16 = vadd.f32 -1.0, %v582_v15 }
 0x22b   :  { %v355_v17 = vsel %vm350_vm3, %v347_v12, %v476_v16 }
 0x22c   :  { %564 = vmatmul.mubr.f32.vlgmr.msra.gmra.mxu1 %v355_v17 }
 0x2ec   :  { %v445_v19 = vpop.f32.mrf.mxu1 }
 0x2ed   :  { %v446_v20 = vadd.f32 %v477_v18, %v445_v19 }
 0x2ee   :  { %v565_v21 = vpop.f32.mrf.mxu1 }
 0x2ef   :  { %v450_v22 = vmin.f32 %v446_v20, 0.0  ;;  %vm449_vm4 = vcmp.gt.f32.partialorder %v446_v20, 0.0 }
 0x2f1   :  { %v451_v23 = vmul.f32 1.442695, %v450_v22 }
 0x2f3   :  { %583 = vpow2.f32 %v451_v23 }
 0x300   :  { %v584_v24 = vpop.eup %583 }
 0x301   :  { %v478_v25 = vadd.f32 -1.0, %v584_v24 }
 0x303   :  { %v454_v26 = vsel %vm449_vm4, %v446_v20, %v478_v25 }
 0x304   :  { %455 = vst [vmem:[#allocation10] sm:$0xff] %v454_v26 }
 0x305   :  { %676 = shalt.err (!%p673_p10)
}
 0x306   :  { %465 = dma.vmem_to_hbm [thread:$0]  %s463_s26, 128, %s792_s7, [#allocation4]  }
 0x307   :  { %691 = dma.done.wait [#allocation4], 128  }
 0x308   :  { %692 = vsyncadd [#allocation4], 4294967168 }
 0x309   :  { %469 = vsyncpa [#allocation3], 1 }
 0x30a   :  { %470 = vsyncpa [#allocation6], 1 }
 0x30b   :  { %471 = vsyncpa [#allocation9], 1 }
 0x30c   :  { %472 = vsyncpa [#allocation4], 1 }

</bundles_post_ra>
